<compile_context>
chip_gen: v7x
topology: tpu7x:2x2x1
jax: 0.10.0
libtpu: 0.0.40
codegen_flags: <defaults>
</compile_context>

<pallas_src>
import functools

import jax
import jax.numpy as jnp
from jax.experimental import pallas as pl
from jax.experimental.pallas import tpu as pltpu


def _ls_ce_rows_kernel(x_ref, tgt_ref, out_ref, *, smoothing):
    """Per-row label-smoothed cross entropy for one (TN, C) tile of logits.

    x_ref:   (TN, C) logits in native dtype (cast to f32 in-kernel)
    tgt_ref: (TN, 1) int32 class indices
    out_ref: (TN, 1) f32 per-row loss
    """
    confidence = 1.0 - smoothing

    x = x_ref[...].astype(jnp.float32)                       # (TN, C) f32
    tgt = tgt_ref[...]                                       # (TN, 1) int32
    tn, c = x.shape

    # Numerically stable pieces of log_softmax without materializing logprobs:
    #   logprobs    = (x - m) - lse
    #   nll_loss    = lse - shifted[i, target[i]]
    #   smooth_loss = lse - mean(shifted, axis=-1)
    m = jnp.max(x, axis=-1, keepdims=True)                   # (TN, 1)
    shifted = x - m                                          # (TN, C)
    lse = jnp.log(jnp.sum(jnp.exp(shifted), axis=-1, keepdims=True))  # (TN, 1)

    col = jax.lax.broadcasted_iota(jnp.int32, (tn, c), 1)    # (TN, C)
    tgt_shifted = jnp.sum(jnp.where(col == tgt, shifted, 0.0),
                          axis=-1, keepdims=True)            # (TN, 1)
    sum_shifted = jnp.sum(shifted, axis=-1, keepdims=True)   # (TN, 1)

    nll_loss = lse - tgt_shifted                             # (TN, 1)
    smooth_loss = lse - sum_shifted * (1.0 / c)              # (TN, 1)
    out_ref[...] = confidence * nll_loss + smoothing * smooth_loss


def _vmem_limit_bytes():
    # Conservative scoped-VMEM target per generation:
    #   v5e/v6e (128 MiB physical) -> 64 MiB, v7x (64 MiB physical) -> 32 MiB.
    try:
        cap = pltpu.get_tpu_info().vmem_capacity_bytes
    except Exception:
        cap = 64 * 1024 * 1024
    return int(min(cap // 2, 100 * 1024 * 1024))


def label_smoothing_cross_entropy(x, target, smoothing=0.1, block_rows=None):
    """Pallas-backed equivalent of LabelSmoothingCrossEntropy(smoothing)(x, target)."""
    n, c = x.shape
    vmem_limit = _vmem_limit_bytes()

    if block_rows is None:
        # Size the row tile so one tile's f32 working set plus 2-deep input
        # buffering stays well inside the scoped-VMEM limit.
        per_buffer_budget = vmem_limit // 8
        block_rows = max(8, per_buffer_budget // (c * 4))
        block_rows = min(block_rows, 1024)
    tn = max(8, (int(block_rows) // 8) * 8)
    if n <= tn:
        tn = -(-n // 8) * 8          # single block covering the (padded) batch
    n_pad = -(-n // tn) * tn
    grid = (n_pad // tn,)

    # TODO(synk): for very large C (e.g. 128k+ vocab) add a second "arbitrary"
    # grid axis over classes with online max/LSE accumulation (flash-softmax
    # style) so VMEM usage is bounded independent of C.

    tgt = target.astype(jnp.int32)
    if n_pad != n:
        # Zero-pad rows; they are excluded from the final mean in the wrapper.
        x = jnp.pad(x, ((0, n_pad - n), (0, 0)))
        tgt = jnp.pad(tgt, ((0, n_pad - n),))
    tgt2d = tgt.reshape(n_pad, 1)

    per_row = pl.pallas_call(
        functools.partial(_ls_ce_rows_kernel, smoothing=float(smoothing)),
        out_shape=jax.ShapeDtypeStruct((n_pad, 1), jnp.float32),
        grid=grid,
        in_specs=[
            pl.BlockSpec((tn, c), lambda i: (i, 0)),   # logits, native dtype
            pl.BlockSpec((tn, 1), lambda i: (i, 0)),   # targets (int32)
        ],
        out_specs=pl.BlockSpec((tn, 1), lambda i: (i, 0)),
        compiler_params=pltpu.CompilerParams(
            dimension_semantics=("parallel",),         # megacore-splittable on v7x
            vmem_limit_bytes=vmem_limit,
        ),
    )(x, tgt2d)

    # Final mean over the true batch rows (padded rows dropped, divide by true N).
    return jnp.sum(per_row[:n, 0]) / n


def _reference(x, target, smoothing=0.1):
    confidence = 1.0 - smoothing
    logprobs = jax.nn.log_softmax(x.astype(jnp.float32), axis=-1)
    nll = -jnp.take_along_axis(logprobs, target[:, None].astype(jnp.int32), axis=-1)[:, 0]
    smooth = -jnp.mean(logprobs, axis=-1)
    return jnp.mean(confidence * nll + smoothing * smooth)


if __name__ == "__main__":
    key = jax.random.PRNGKey(0)
    kx, kt = jax.random.split(key)

    # Small shapes consistent with the module's forward: batch=8, classes=32.
    N, C = 8, 32
    x = jax.random.normal(kx, (N, C), dtype=jnp.float32)
    target = jax.random.randint(kt, (N,), 0, C, dtype=jnp.int32)

    loss = jax.block_until_ready(label_smoothing_cross_entropy(x, target, smoothing=0.1))
    ref = _reference(x, target, smoothing=0.1)
    assert jnp.allclose(loss, ref, atol=1e-5, rtol=1e-5), (loss, ref)

    # Exercise the tiled path: multi-tile grid, bf16 input, N not a tile multiple.
    N2, C2 = 36, 128
    x2 = jax.random.normal(kx, (N2, C2), dtype=jnp.bfloat16)
    t2 = jax.random.randint(kt, (N2,), 0, C2, dtype=jnp.int32)
    loss2 = jax.block_until_ready(
        label_smoothing_cross_entropy(x2, t2, smoothing=0.1, block_rows=16))
    ref2 = _reference(x2, t2, smoothing=0.1)
    assert jnp.allclose(loss2, ref2, atol=1e-4, rtol=1e-4), (loss2, ref2)

    print("KERNEL_OK")
</pallas_src>

<mosaic_0001>
module attributes {stable_mosaic.version = 11 : i64} {
  func.func @_ls_ce_rows_kernel(%arg0: i32, %arg1: memref<8x32xf32, #tpu.memory_space<vmem>>, %arg2: memref<8x1xi32, #tpu.memory_space<vmem>>, %arg3: memref<8x1xf32, #tpu.memory_space<vmem>>) attributes {dimension_semantics = [#tpu.dimension_semantics<parallel>], iteration_bounds = array<i64: 1>, scalar_prefetch = 0 : i64, scratch_operands = 0 : i64, tpu.core_type = #tpu.core_type<tc>, window_params = [{transform_indices = @transform_0, window_bounds = array<i64: 8, 32>}, {transform_indices = @transform_1, window_bounds = array<i64: 8, 1>}, {transform_indices = @transform_2, window_bounds = array<i64: 8, 1>}]} {
    %c0 = arith.constant 0 : index
    %c0_0 = arith.constant 0 : index
    %0 = vector.load %arg1[%c0, %c0_0] : memref<8x32xf32, #tpu.memory_space<vmem>>, vector<8x32xf32>
    %c0_1 = arith.constant 0 : index
    %c0_2 = arith.constant 0 : index
    %1 = vector.load %arg2[%c0_1, %c0_2] : memref<8x1xi32, #tpu.memory_space<vmem>>, vector<8x1xi32>
    %cst = arith.constant dense<0xFF800000> : vector<8xf32>
    %2 = vector.multi_reduction <maximumf>, %0, %cst [1] : vector<8x32xf32> to vector<8xf32>
    %3 = vector.shape_cast %2 : vector<8xf32> to vector<8x1xf32>
    %4 = vector.broadcast %3 : vector<8x1xf32> to vector<8x32xf32>
    %5 = arith.subf %0, %4 : vector<8x32xf32>
    %6 = math.exp %5 : vector<8x32xf32>
    %cst_3 = arith.constant dense<0.000000e+00> : vector<8xf32>
    %7 = vector.multi_reduction <add>, %6, %cst_3 [1] : vector<8x32xf32> to vector<8xf32>
    %8 = vector.shape_cast %7 : vector<8xf32> to vector<8x1xf32>
    %9 = math.log %8 : vector<8x1xf32>
    %10 = tpu.iota {dimensions = array<i32: 1>} : vector<8x32xi32>
    %11 = vector.broadcast %1 : vector<8x1xi32> to vector<8x32xi32>
    %12 = arith.cmpi eq, %10, %11 : vector<8x32xi32>
    %cst_4 = arith.constant 0.000000e+00 : f32
    %13 = vector.broadcast %cst_4 : f32 to vector<8x32xf32>
    %14 = arith.select %12, %5, %13 : vector<8x32xi1>, vector<8x32xf32>
    %cst_5 = arith.constant dense<0.000000e+00> : vector<8xf32>
    %15 = vector.multi_reduction <add>, %14, %cst_5 [1] : vector<8x32xf32> to vector<8xf32>
    %16 = vector.shape_cast %15 : vector<8xf32> to vector<8x1xf32>
    %cst_6 = arith.constant dense<0.000000e+00> : vector<8xf32>
    %17 = vector.multi_reduction <add>, %5, %cst_6 [1] : vector<8x32xf32> to vector<8xf32>
    %18 = vector.shape_cast %17 : vector<8xf32> to vector<8x1xf32>
    %19 = arith.subf %9, %16 : vector<8x1xf32>
    %cst_7 = arith.constant 3.125000e-02 : f32
    %20 = vector.broadcast %cst_7 : f32 to vector<8x1xf32>
    %21 = arith.mulf %18, %20 : vector<8x1xf32>
    %22 = arith.subf %9, %21 : vector<8x1xf32>
    %cst_8 = arith.constant 0.899999976 : f32
    %23 = vector.broadcast %cst_8 : f32 to vector<8x1xf32>
    %24 = arith.mulf %23, %19 : vector<8x1xf32>
    %cst_9 = arith.constant 1.000000e-01 : f32
    %25 = vector.broadcast %cst_9 : f32 to vector<8x1xf32>
    %26 = arith.mulf %25, %22 : vector<8x1xf32>
    %27 = arith.addf %24, %26 : vector<8x1xf32>
    %c0_10 = arith.constant 0 : index
    %c0_11 = arith.constant 0 : index
    %28 = vector.load %arg3[%c0_10, %c0_11] : memref<8x1xf32, #tpu.memory_space<vmem>>, vector<8x1xf32>
    tpu.vector_store %arg3[%c0_10, %c0_11], %27 {strides = array<i32>} : memref<8x1xf32, #tpu.memory_space<vmem>>, vector<8x1xf32>,
    return
  }
  func.func @transform_0(%arg0: i32) -> (i32, i32) {
    %c0_i32 = arith.constant 0 : i32
    %c0_i32_0 = arith.constant 0 : i32
    return %arg0, %c0_i32 : i32, i32
  }
  func.func @transform_1(%arg0: i32) -> (i32, i32) {
    %c0_i32 = arith.constant 0 : i32
    %c0_i32_0 = arith.constant 0 : i32
    return %arg0, %c0_i32 : i32, i32
  }
  func.func @transform_2(%arg0: i32) -> (i32, i32) {
    %c0_i32 = arith.constant 0 : i32
    %c0_i32_0 = arith.constant 0 : i32
    return %arg0, %c0_i32 : i32, i32
  }
}

</mosaic_0001>

<bundles_post_ra>
// kernel: tpu_custom_call.1
= control target key start
LH: loop header
LB: loop body
LE: loop exit
PB: predicated region body
PF: predicated region fallthrough
CT: control target
= control target key end

     0   :  { %vm13_vm0 = vcmask 261120   ;;  %v56_v1 = vmov 0   ;;  %v25_v7 = vlaneseq  ;;  %vm44_vm2 = vcmask 7168   ;;  %s85_s0 = inlined_call_operand.vmem [shape: f32[8,32], index: 0, kind: input, shape index: {}]   ;;  %s86_s1 = inlined_call_operand.vmem [shape: s32[8,1], index: 1, kind: input, shape index: {}]   ;;  %s87_s2 = inlined_call_operand.vmem [shape: f32[8,1], index: 2, kind: output, shape index: {}]  }
   0x1   :  { %v11_v0 = vld [vmem:[%s85_s0] sm:$0xff]  ;;  %51 = vset.pattern.permute.xlu0 %v56_v1 }
   0x2   :  { %v14_v2 = vsel %vm13_vm0, %v11_v0, -inf  ;;  %v12_v3 = vld [vmem:[%s86_s1] sm:$0xff]  ;;  %v26_v8 = vand.u32 127, %v25_v7 }
   0x3   :  { %15 = vmax.xlane.f32.xlu0 %v14_v2 }
  0x19   :  { %28 = vperm.xlu0 %51, %v12_v3  }
  0x90   :  { %v16_v4 = vpop.xlane.xlu0 %15 }
  0x91   :  { %v17_v5 = vsub.f32 %v11_v0, %v16_v4 }
  0x93   :  { %v18_v6 = vmul.f32 1.442695, %v17_v5  ;;  %v35_v12 = vsel %vm13_vm0, %v17_v5, 0.0 }
  0x95   :  { %52 = vpow2.f32 %v18_v6 }
  0x98   :  { %v29_v10 = vpop.permute.xlu0 %28 }
  0x99   :  { %vm30_vm1 = vcmp.eq.s32.totalorder %v26_v8, %v29_v10 }
  0x9a   :  { %v31_v13 = vsel %vm30_vm1, %v17_v5, 0.0 }
  0x9b   :  { %v32_v14 = vsel %vm13_vm0, %v31_v13, 0.0 }
  0x9f   :  { %v53_v9 = vpop.eup %52 }
  0xa0   :  { %v20_v11 = vsel %vm13_vm0, %v53_v9, 0.0 }
  0xa1   :  { %21 = vadd.xlane.f32.xlu1 %v20_v11 }
  0xa5   :  { %36 = vadd.xlane.f32.xlu1 %v35_v12 }
  0xa9   :  { %33 = vadd.xlane.f32.xlu1 %v32_v14 }
 0x12e   :  { %v22_v15 = vpop.xlane.xlu1 %21 }
 0x12f   :  { %54 = vlog2.f32 %v22_v15 }
 0x132   :  { %v37_v16 = vpop.xlane.xlu1 %36 }
 0x133   :  { %v39_v19 = vmul.f32 0.03125, %v37_v16 }
 0x136   :  { %v34_v20 = vpop.xlane.xlu1 %33 }
 0x139   :  { %v55_v17 = vpop.eup %54 }
 0x13a   :  { %v24_v18 = vmul.f32 0.6931472, %v55_v17 }
 0x13c   :  { %v40_v21 = vsub.f32 %v24_v18, %v39_v19  ;;  %v38_v22 = vsub.f32 %v24_v18, %v34_v20 }
 0x13e   :  { %v42_v23 = vmul.f32 0.1, %v40_v21  ;;  %v41_v24 = vmul.f32 0.9, %v38_v22 }
 0x140   :  { %v43_v25 = vadd.f32 %v42_v23, %v41_v24 }
 0x142   :  { %45 = vst.msk [vmem:[%s87_s2] sm:$0xff] %vm44_vm2, %v43_v25 }

</bundles_post_ra>
